<compile_context>
chip_gen: v7x
topology: tpu7x:2x2x1
jax: 0.10.0
libtpu: 0.0.40
codegen_flags: <defaults>
</compile_context>

<pallas_src>
import functools

import jax
import jax.numpy as jnp
from jax import lax
from jax.experimental import pallas as pl
from jax.experimental.pallas import tpu as pltpu

NEG_SLOPE = 0.01                 # nn.LeakyReLU default
EPS = 1e-5                       # nn.InstanceNorm3d default
VMEM_LIMIT = 48 * 1024 * 1024    # conservative: fits v5e/v6e/v7x scoped budgets


def _pick_tile(s, max_rows=4096):
    """Largest row-tile <= max_rows that divides s and is a multiple of 8."""
    if s <= max_rows:
        return s
    t = (max_rows // 8) * 8
    while t >= 8:
        if s % t == 0:
            return t
        t -= 8
    return s


# ----------------------------- Pallas kernels ------------------------------ #

def _down_stats_kernel(x_ref, w_ref, b_ref, y_ref, st_ref):
    # x_ref: (1, Ts, 8*Cin) bf16   w_ref: (8*Cin, Cout) bf16   b_ref: (1, Cout) f32
    # y_ref: (1, Ts, Cout) f32     st_ref: (1, 2, Cout) f32 sum/sumsq carry
    t = pl.program_id(1)
    y = jnp.dot(x_ref[0], w_ref[...],
                preferred_element_type=jnp.float32) + b_ref[...]
    y_ref[0] = y

    @pl.when(t == 0)
    def _():
        st_ref[...] = jnp.zeros_like(st_ref)

    s = jnp.sum(y, axis=0, keepdims=True)
    ss = jnp.sum(y * y, axis=0, keepdims=True)
    st_ref[...] += jnp.concatenate([s, ss], axis=0)[None]


def _luconv_stats_kernel(h0_ref, h1_ref, h2_ref, w_ref, b_ref, y_ref, st_ref,
                         *, Ho, Wo):
    # h{0,1,2}_ref: (1, 1, Hp, Wp, C) bf16 -- padded D-slices t, t+1, t+2
    # w_ref: (27, C, C) bf16   b_ref: (1, C) f32
    # y_ref: (1, 1, Ho*Wo, C) f32   st_ref: (1, 2, C) f32 sum/sumsq carry
    t = pl.program_id(1)
    C = w_ref.shape[-1]
    refs = (h0_ref, h1_ref, h2_ref)
    acc = jnp.zeros((Ho * Wo, C), jnp.float32)
    for kd in range(3):
        slab = refs[kd][0, 0]                      # (Hp, Wp, C) bf16 in VMEM
        for kh in range(3):
            for kw in range(3):
                patch = slab[kh:kh + Ho, kw:kw + Wo, :].reshape(Ho * Wo, C)
                acc = acc + jnp.dot(patch, w_ref[kd * 9 + kh * 3 + kw],
                                    preferred_element_type=jnp.float32)
    y = acc + b_ref[...]
    y_ref[0, 0] = y

    @pl.when(t == 0)
    def _():
        st_ref[...] = jnp.zeros_like(st_ref)

    s = jnp.sum(y, axis=0, keepdims=True)
    ss = jnp.sum(y * y, axis=0, keepdims=True)
    st_ref[...] += jnp.concatenate([s, ss], axis=0)[None]


def _finalize_kernel(*refs, inv_n, add_residual):
    # refs: y (1,Ts,C), stats (1,2,C), gamma (1,C), beta (1,C),
    #       [res (1,Ts,C)], out (1,Ts,C) -- all f32
    if add_residual:
        y_ref, st_ref, g_ref, be_ref, res_ref, o_ref = refs
    else:
        y_ref, st_ref, g_ref, be_ref, o_ref = refs
        res_ref = None
    st = st_ref[0]                                 # (2, C)
    mean = st[0:1] * inv_n                         # (1, C)
    var = jnp.maximum(st[1:2] * inv_n - mean * mean, 0.0)
    yn = (y_ref[0] - mean) * lax.rsqrt(var + EPS) * g_ref[...] + be_ref[...]
    yn = jnp.where(yn >= 0, yn, NEG_SLOPE * yn)
    if add_residual:
        yn = yn + res_ref[0]
    o_ref[0] = yn


# ------------------------------ pallas_call wrappers ----------------------- #

def _down_pass1(xp, wk, bias):
    B, S, F = xp.shape
    Cout = wk.shape[1]
    Ts = _pick_tile(S)
    return pl.pallas_call(
        _down_stats_kernel,
        out_shape=(jax.ShapeDtypeStruct((B, S, Cout), jnp.float32),
                   jax.ShapeDtypeStruct((B, 2, Cout), jnp.float32)),
        grid_spec=pltpu.PrefetchScalarGridSpec(
            num_scalar_prefetch=0, grid=(B, S // Ts),
            in_specs=[pl.BlockSpec((1, Ts, F), lambda b, t: (b, t, 0)),
                      pl.BlockSpec((F, Cout), lambda b, t: (0, 0)),
                      pl.BlockSpec((1, Cout), lambda b, t: (0, 0))],
            out_specs=(pl.BlockSpec((1, Ts, Cout), lambda b, t: (b, t, 0)),
                       pl.BlockSpec((1, 2, Cout), lambda b, t: (b, 0, 0)))),
        compiler_params=pltpu.CompilerParams(
            dimension_semantics=("parallel", "arbitrary"),
            vmem_limit_bytes=VMEM_LIMIT),
    )(xp, wk, bias.reshape(1, -1).astype(jnp.float32))


def _luconv_pass1(hp, w27, bias, Do, Ho, Wo):
    B, Dp, Hp, Wp, C = hp.shape

    def slab_spec(off):
        def idx(b, t):
            return (b, t + off, 0, 0, 0)
        return pl.BlockSpec((1, 1, Hp, Wp, C), idx)

    return pl.pallas_call(
        functools.partial(_luconv_stats_kernel, Ho=Ho, Wo=Wo),
        out_shape=(jax.ShapeDtypeStruct((B, Do, Ho * Wo, C), jnp.float32),
                   jax.ShapeDtypeStruct((B, 2, C), jnp.float32)),
        grid_spec=pltpu.PrefetchScalarGridSpec(
            num_scalar_prefetch=0, grid=(B, Do),
            in_specs=[slab_spec(0), slab_spec(1), slab_spec(2),
                      pl.BlockSpec((27, C, C), lambda b, t: (0, 0, 0)),
                      pl.BlockSpec((1, C), lambda b, t: (0, 0))],
            out_specs=(pl.BlockSpec((1, 1, Ho * Wo, C),
                                    lambda b, t: (b, t, 0, 0)),
                       pl.BlockSpec((1, 2, C), lambda b, t: (b, 0, 0)))),
        compiler_params=pltpu.CompilerParams(
            dimension_semantics=("parallel", "arbitrary"),
            vmem_limit_bytes=VMEM_LIMIT),
    )(hp, hp, hp, w27, bias.reshape(1, -1).astype(jnp.float32))


def _finalize(y, st, gamma, beta, n, res=None):
    B, S, C = y.shape
    Ts = _pick_tile(S)
    in_specs = [pl.BlockSpec((1, Ts, C), lambda b, t: (b, t, 0)),
                pl.BlockSpec((1, 2, C), lambda b, t: (b, 0, 0)),
                pl.BlockSpec((1, C), lambda b, t: (0, 0)),
                pl.BlockSpec((1, C), lambda b, t: (0, 0))]
    args = [y, st, gamma.reshape(1, -1).astype(jnp.float32),
            beta.reshape(1, -1).astype(jnp.float32)]
    if res is not None:
        in_specs.append(pl.BlockSpec((1, Ts, C), lambda b, t: (b, t, 0)))
        args.append(res)
    return pl.pallas_call(
        functools.partial(_finalize_kernel, inv_n=1.0 / float(n),
                          add_residual=res is not None),
        out_shape=jax.ShapeDtypeStruct((B, S, C), jnp.float32),
        grid_spec=pltpu.PrefetchScalarGridSpec(
            num_scalar_prefetch=0, grid=(B, S // Ts),
            in_specs=in_specs,
            out_specs=pl.BlockSpec((1, Ts, C), lambda b, t: (b, t, 0))),
        compiler_params=pltpu.CompilerParams(
            dimension_semantics=("parallel", "parallel"),
            vmem_limit_bytes=VMEM_LIMIT),
    )(*args)


# ------------------------------- forward pass ------------------------------ #

def down_transition3d_forward(x_ncdhw, params):
    """DownTransition3d.forward.  x_ncdhw: (B, Cin, D, H, W) float32."""
    # TODO(synk): Dropout3d(p=prob) is modeled as identity (inference mode);
    # training-mode whole-channel dropout is not implemented.
    B, Cin, D, H, W = x_ncdhw.shape
    Cout = params["w_down"].shape[0]
    Do, Ho, Wo = D // 2, H // 2, W // 2
    S = Do * Ho * Wo

    # Down conv (kernel-2 / stride-2) == matmul over disjoint 2x2x2 patches.
    x = jnp.transpose(x_ncdhw.astype(jnp.bfloat16), (0, 2, 3, 4, 1))   # NDHWC bf16
    xp = x.reshape(B, Do, 2, Ho, 2, Wo, 2, Cin)
    xp = xp.transpose(0, 1, 3, 5, 2, 4, 6, 7).reshape(B, S, 8 * Cin)
    wk = jnp.transpose(params["w_down"], (2, 3, 4, 1, 0)) \
            .reshape(8 * Cin, Cout).astype(jnp.bfloat16)

    y0, st0 = _down_pass1(xp, wk, params["b_down"])
    down = _finalize(y0, st0, params["g_down"], params["be_down"], n=S)  # (B,S,Cout)

    n_layers = len(params["layers"])
    if n_layers == 0:
        h = down + down
    else:
        h = down
        for i, layer in enumerate(params["layers"]):
            hp = jnp.pad(h.astype(jnp.bfloat16).reshape(B, Do, Ho, Wo, Cout),
                         ((0, 0), (1, 1), (1, 1), (1, 1), (0, 0)))
            w27 = jnp.transpose(layer["w"], (2, 3, 4, 1, 0)) \
                     .reshape(27, Cout, Cout).astype(jnp.bfloat16)
            y, st = _luconv_pass1(hp, w27, layer["b"], Do, Ho, Wo)
            h = _finalize(y.reshape(B, S, Cout), st, layer["g"], layer["be"],
                          n=S, res=down if i == n_layers - 1 else None)

    return h.reshape(B, Do, Ho, Wo, Cout).transpose(0, 4, 1, 2, 3)       # NCDHW


# ----------------------------- pure-JAX reference -------------------------- #

REF_PREC = jax.lax.Precision.HIGHEST


def _leaky(x):
    return jnp.where(x >= 0, x, NEG_SLOPE * x)


def _inorm_ref(x, g, b):
    m = jnp.mean(x, axis=(2, 3, 4), keepdims=True)
    v = jnp.mean(jnp.square(x - m), axis=(2, 3, 4), keepdims=True)
    return ((x - m) * lax.rsqrt(v + EPS) * g.reshape(1, -1, 1, 1, 1)
            + b.reshape(1, -1, 1, 1, 1))


def reference_forward(x, params):
    dn = lax.conv_general_dilated(
        x, params["w_down"], window_strides=(2, 2, 2), padding="VALID",
        dimension_numbers=("NCDHW", "OIDHW", "NCDHW"), precision=REF_PREC)
    dn = dn + params["b_down"].reshape(1, -1, 1, 1, 1)
    dn = _leaky(_inorm_ref(dn, params["g_down"], params["be_down"]))
    h = dn
    for layer in params["layers"]:
        c = lax.conv_general_dilated(
            h, layer["w"], window_strides=(1, 1, 1),
            padding=((1, 1), (1, 1), (1, 1)),
            dimension_numbers=("NCDHW", "OIDHW", "NCDHW"), precision=REF_PREC)
        c = c + layer["b"].reshape(1, -1, 1, 1, 1)
        h = _leaky(_inorm_ref(c, layer["g"], layer["be"]))
    return h + dn


# --------------------------------- params ---------------------------------- #

def init_params(key, in_chans, out_chans, n_convs):
    ks = jax.random.split(key, 4 + 4 * n_convs)
    p = {
        "w_down": 0.2 * jax.random.normal(ks[0], (out_chans, in_chans, 2, 2, 2),
                                          jnp.float32),
        "b_down": 0.1 * jax.random.normal(ks[1], (out_chans,), jnp.float32),
        "g_down": 1.0 + 0.1 * jax.random.normal(ks[2], (out_chans,), jnp.float32),
        "be_down": 0.1 * jax.random.normal(ks[3], (out_chans,), jnp.float32),
        "layers": [],
    }
    for i in range(n_convs):
        kk = ks[4 + 4 * i: 8 + 4 * i]
        p["layers"].append(dict(
            w=0.1 * jax.random.normal(kk[0], (out_chans, out_chans, 3, 3, 3),
                                      jnp.float32),
            b=0.1 * jax.random.normal(kk[1], (out_chans,), jnp.float32),
            g=1.0 + 0.1 * jax.random.normal(kk[2], (out_chans,), jnp.float32),
            be=0.1 * jax.random.normal(kk[3], (out_chans,), jnp.float32)))
    return p


# ----------------------------------- main ----------------------------------- #

if __name__ == "__main__":
    B, Cin, Cout, D, H, W, nConvs = 2, 4, 8, 8, 8, 8, 2
    key = jax.random.PRNGKey(0)
    kx, kp = jax.random.split(key)
    x = jax.random.normal(kx, (B, Cin, D, H, W), jnp.float32)
    params = init_params(kp, Cin, Cout, nConvs)

    out = down_transition3d_forward(x, params)
    out = jax.block_until_ready(out)

    ref = jax.block_until_ready(reference_forward(x, params))
    assert out.shape == ref.shape == (B, Cout, D // 2, H // 2, W // 2), out.shape
    assert jnp.allclose(out, ref, atol=5e-2, rtol=5e-2), (
        float(jnp.max(jnp.abs(out - ref))))

    print("KERNEL_OK")
</pallas_src>

<mosaic_0001>
module attributes {stable_mosaic.version = 11 : i64} {
  func.func @_down_stats_kernel(%arg0: i32, %arg1: i32, %arg2: memref<1x64x32xbf16, #tpu.memory_space<vmem>>, %arg3: memref<32x8xbf16, #tpu.memory_space<vmem>>, %arg4: memref<1x8xf32, #tpu.memory_space<vmem>>, %arg5: memref<1x64x8xf32, #tpu.memory_space<vmem>>, %arg6: memref<1x2x8xf32, #tpu.memory_space<vmem>>) attributes {dimension_semantics = [#tpu.dimension_semantics<parallel>, #tpu.dimension_semantics<arbitrary>], iteration_bounds = array<i64: 2, 1>, scalar_prefetch = 0 : i64, scratch_operands = 0 : i64, tpu.core_type = #tpu.core_type<tc>, window_params = [{transform_indices = @transform_0, window_bounds = array<i64: 1, 64, 32>}, {pipeline_mode = #tpu.pipeline_mode<synchronous>, transform_indices = @transform_1, window_bounds = array<i64: 32, 8>}, {pipeline_mode = #tpu.pipeline_mode<synchronous>, transform_indices = @transform_2, window_bounds = array<i64: 1, 8>}, {transform_indices = @transform_3, window_bounds = array<i64: 1, 64, 8>}, {transform_indices = @transform_4, window_bounds = array<i64: 1, 2, 8>}]} {
    %c0 = arith.constant 0 : index
    %c0_0 = arith.constant 0 : index
    %c0_1 = arith.constant 0 : index
    %0 = vector.load %arg2[%c0, %c0_0, %c0_1] : memref<1x64x32xbf16, #tpu.memory_space<vmem>>, vector<1x64x32xbf16>
    %1 = vector.shape_cast %0 : vector<1x64x32xbf16> to vector<64x32xbf16>
    %c0_2 = arith.constant 0 : index
    %c0_3 = arith.constant 0 : index
    %2 = vector.load %arg3[%c0_2, %c0_3] : memref<32x8xbf16, #tpu.memory_space<vmem>>, vector<32x8xbf16>
    %cst = arith.constant dense<0.000000e+00> : vector<64x8xf32>
    %3 = tpu.matmul %1, %2, %cst {dimension_numbers = #tpu.dot_dimension_numbers<[1], [0], [0], [1], [0, 0, 1, 1], [], []>} : vector<64x32xbf16>, vector<32x8xbf16>, vector<64x8xf32> -> vector<64x8xf32>
    %c0_4 = arith.constant 0 : index
    %c0_5 = arith.constant 0 : index
    %4 = vector.load %arg4[%c0_4, %c0_5] : memref<1x8xf32, #tpu.memory_space<vmem>>, vector<1x8xf32>
    %5 = vector.broadcast %4 : vector<1x8xf32> to vector<64x8xf32>
    %6 = arith.addf %3, %5 : vector<64x8xf32>
    %c0_6 = arith.constant 0 : index
    %c0_7 = arith.constant 0 : index
    %c0_8 = arith.constant 0 : index
    %7 = vector.load %arg5[%c0_6, %c0_7, %c0_8] : memref<1x64x8xf32, #tpu.memory_space<vmem>>, vector<1x64x8xf32>
    %8 = vector.shape_cast %7 : vector<1x64x8xf32> to vector<64x8xf32>
    %9 = vector.shape_cast %6 : vector<64x8xf32> to vector<1x64x8xf32>
    tpu.vector_store %arg5[%c0_6, %c0_7, %c0_8], %9 {strides = array<i32>} : memref<1x64x8xf32, #tpu.memory_space<vmem>>, vector<1x64x8xf32>,
    %c0_i32 = arith.constant 0 : i32
    %10 = arith.cmpi eq, %arg1, %c0_i32 : i32
    %11 = arith.extui %10 : i1 to i32
    %c0_i32_9 = arith.constant 0 : i32
    %12 = arith.cmpi ne, %11, %c0_i32_9 : i32
    scf.if %12 {
      %cst_18 = arith.constant 0.000000e+00 : f32
      %23 = vector.broadcast %cst_18 : f32 to vector<1x2x8xf32>
      %c0_19 = arith.constant 0 : index
      %c0_20 = arith.constant 0 : index
      %c0_21 = arith.constant 0 : index
      %24 = vector.load %arg6[%c0_19, %c0_20, %c0_21] : memref<1x2x8xf32, #tpu.memory_space<vmem>>, vector<1x2x8xf32>
      tpu.vector_store %arg6[%c0_19, %c0_20, %c0_21], %23 {strides = array<i32>} : memref<1x2x8xf32, #tpu.memory_space<vmem>>, vector<1x2x8xf32>,
    } else {
    }
    %cst_10 = arith.constant dense<0.000000e+00> : vector<8xf32>
    %13 = vector.multi_reduction <add>, %6, %cst_10 [0] : vector<64x8xf32> to vector<8xf32>
    %14 = vector.shape_cast %13 : vector<8xf32> to vector<1x8xf32>
    %15 = arith.mulf %6, %6 : vector<64x8xf32>
    %cst_11 = arith.constant dense<0.000000e+00> : vector<8xf32>
    %16 = vector.multi_reduction <add>, %15, %cst_11 [0] : vector<64x8xf32> to vector<8xf32>
    %17 = vector.shape_cast %16 : vector<8xf32> to vector<1x8xf32>
    %c0_12 = arith.constant 0 : index
    %c0_13 = arith.constant 0 : index
    %c0_14 = arith.constant 0 : index
    %18 = vector.load %arg6[%c0_12, %c0_13, %c0_14] : memref<1x2x8xf32, #tpu.memory_space<vmem>>, vector<1x2x8xf32>
    %19 = tpu.concatenate %14, %17 in 0 : vector<1x8xf32>, vector<1x8xf32> -> vector<2x8xf32>
    %20 = vector.shape_cast %19 : vector<2x8xf32> to vector<1x2x8xf32>
    %21 = arith.addf %18, %20 : vector<1x2x8xf32>
    %c0_15 = arith.constant 0 : index
    %c0_16 = arith.constant 0 : index
    %c0_17 = arith.constant 0 : index
    %22 = vector.load %arg6[%c0_15, %c0_16, %c0_17] : memref<1x2x8xf32, #tpu.memory_space<vmem>>, vector<1x2x8xf32>
    tpu.vector_store %arg6[%c0_15, %c0_16, %c0_17], %21 {strides = array<i32>} : memref<1x2x8xf32, #tpu.memory_space<vmem>>, vector<1x2x8xf32>,
    return
  }
  func.func @transform_0(%arg0: i32, %arg1: i32) -> (i32, i32, i32) {
    %c0_i32 = arith.constant 0 : i32
    %c0_i32_0 = arith.constant 0 : i32
    return %arg0, %arg1, %c0_i32 : i32, i32, i32
  }
  func.func @transform_1(%arg0: i32, %arg1: i32) -> (i32, i32) {
    %c0_i32 = arith.constant 0 : i32
    %c0_i32_0 = arith.constant 0 : i32
    %c0_i32_1 = arith.constant 0 : i32
    return %c0_i32, %c0_i32_0 : i32, i32
  }
  func.func @transform_2(%arg0: i32, %arg1: i32) -> (i32, i32) {
    %c0_i32 = arith.constant 0 : i32
    %c0_i32_0 = arith.constant 0 : i32
    %c0_i32_1 = arith.constant 0 : i32
    return %c0_i32, %c0_i32_0 : i32, i32
  }
  func.func @transform_3(%arg0: i32, %arg1: i32) -> (i32, i32, i32) {
    %c0_i32 = arith.constant 0 : i32
    %c0_i32_0 = arith.constant 0 : i32
    return %arg0, %arg1, %c0_i32 : i32, i32, i32
  }
  func.func @transform_4(%arg0: i32, %arg1: i32) -> (i32, i32, i32) {
    %c0_i32 = arith.constant 0 : i32
    %c0_i32_0 = arith.constant 0 : i32
    %c0_i32_1 = arith.constant 0 : i32
    return %arg0, %c0_i32, %c0_i32_0 : i32, i32, i32
  }
}

</mosaic_0001>

<bundles_post_ra>
// kernel: tpu_custom_call.1
= control target key start
LH: loop header
LB: loop body
LE: loop exit
PB: predicated region body
PF: predicated region fallthrough
CT: control target
= control target key end

     0   :  { %10 = vsyncpa [#allocation3], 0  ;;  %s974_s0 = inlined_call_operand.vmem [shape: bf16[2,64,32], index: 0, kind: input, shape index: {}]   ;;  %s975_s1 = inlined_call_operand.vmem [shape: bf16[32,8], index: 1, kind: input, shape index: {}]   ;;  %s976_s2 = inlined_call_operand.vmem [shape: f32[1,8], index: 2, kind: input, shape index: {}]   ;;  %s977_s3 = inlined_call_operand.vmem [shape: f32[2,64,8], index: 3, kind: output, shape index: {0}]   ;;  %s978_s4 = inlined_call_operand.hbm [shape: f32[2,2,8], index: 4, kind: output, shape index: {1}]  }
   0x1   :  { %12 = vsyncpa [#allocation3 + $0x1], 0  ;;  %s804_s15 = smov 0   ;;  %s806_s16 = smov 0  }
   0x2   :  { %s808_s17 = smov 0   ;;  %s810_s18 = smov 0  }
   0x3   :  { %s812_s19 = smov 0   ;;  %s814_s20 = smov 0  }
   0x4 LB: > { %s586_s21 = sadd.s32 4294967295, %s775_s20   ;;  %s587_s22 = sadd.s32 4294967294, %s775_s20   ;;  %s775_s20 = sphi %s814_s20, %s18_s20   ;;  %s771_s19 = sphi %s812_s19, %s985_s19   ;;  %s767_s18 = sphi %s810_s18, %s984_s18   ;;  %s763_s17 = sphi %s808_s17, %s983_s17   ;;  %s759_s16 = sphi %s806_s16, %s982_s16   ;;  %s755_s15 = sphi %s804_s15, %s981_s15  }
   0x5   : > { %s30_s23 = sadd.s32 1, %s771_s19  ;;  %s135_s24 = sadd.s32 1, %s763_s17 }
   0x6   : > { %p32_p0 = scmp.ge.s32.totalorder %s30_s23, 2  ;;  %p145_p1 = scmp.ne.s32.totalorder %s763_s17, %s759_s16 }
   0x7   : > { %p146_p2 = scmp.eq.s32.totalorder %s586_s21, 1  ;;  %p151_p3 = scmp.ne.s32.totalorder %s759_s16, %s755_s15 }
   0x8   : > { %s987_s23 = smov (%p32_p0, %s30_s23), 0  ;;  %p152_p5 = scmp.eq.s32.totalorder %s587_s22, 1 }
   0x9   : > { %p844_p4 = por %p146_p2, %p145_p1  ;;  %s132_s26 = ssub.s32 %s771_s19, %s987_s23 }
   0xa   : > { %p590_p6 = scmp.ge.s32.totalorder %s775_s20, 1  ;;  %p133_p7 = scmp.eq.s32.totalorder %s132_s26, 0 }
   0xb   : > { %p851_p8 = por %p152_p5, %p151_p3  ;;  %p189_p9 = scmp.lt.s32.totalorder %s775_s20, 3 }
   0xc   : > { %s857_s28 = scalar_select %p133_p7, %s763_s17, %s135_s24  }
   0xd   : > { %p190_p10 = pnand %p590_p6, %p189_p9 }
   0xe   : > { %v691_v0 = vld [vmem:[%s975_s1] sm:$0xff] (!%p190_p10)   ;;  %p229_p11 = scmp.lt.s32.totalorder (!%p190_p10), %s767_s18, 1  ;;  %v692_v1 = vld [vmem:[%s975_s1 + $0x8] sm:$0xff] (!%p190_p10)   ;;  %vm300_vm0 = vcmask (!%p190_p10), 261120   ;;  %s225_s12 = sand.u32 (!%p190_p10), 1, %s759_s16   ;;  %vm391_vm1 = vcmask (!%p190_p10), 58368  }
   0xf   : > { %193 = sbr.rel (%p190_p10) target bundleno = 291 (0x123), region = 32  ;;  %619 = vmatprep.subr.bf16.mxu0 (!%p190_p10), %v691_v0  ;;  %631 = vmatprep.subr.bf16.mxu1 (!%p190_p10), %v691_v0  ;;  %s591_s13 = sshll.u32 (!%p190_p10), %s225_s12, 1  ;;  %v777_v6 = vmov (!%p190_p10), 0.0   ;;  %v596_v7 = vld [vmem:[%s976_s2] ss:$0 sm:$0xff] (!%p190_p10)  ;;  %vm378_vm2 = vcmask (!%p190_p10), 64512  }
  0x10   : > { %620 = vmatpush3.bf16.msra.mxu0 (!%p190_p10), %v691_v0  ;;  %633 = vmatpush3.bf16.msra.mxu1 (!%p190_p10), %v691_v0  ;;  %s873_s14 = scalar_lea.vmem (!%p190_p10), [#allocation2], %s591_s13  ;;  %vm444_vm3 = vcmask (!%p190_p10), 1040384   ;;  %s608_s5 = sshll.u32 (!%p190_p10), %s767_s18, 5 }
  0x11   : > { %621 = vmatprep.subr.bf16.mxu0 (!%p190_p10), %v692_v1  ;;  %632 = vmatprep.subr.bf16.mxu1 (!%p190_p10), %v692_v1  ;;  %392 = vst.msk [vmem:[%s873_s14] sm:$0x3] (!%p190_p10), %vm391_vm1, %v777_v6  ;;  %s476_s6 = sshll.u32 (!%p190_p10), %s873_s14, 4  ;;  %s923_s9 = scalar_lea.hbm (!%p190_p10), %s978_s4, %s608_s5  ;;  %s925_s6 = int_to_ptr.vmem [resolvable:$true] %s476_s6 }
  0x12   : > { %s459_s10 = scalar_lea.sflag (!%p190_p10), [#allocation3], %s225_s12 }
  0x14   : > { %622 = vmatpush3.bf16.msra.mxu0 (!%p190_p10), %v692_v1  ;;  %634 = vmatpush3.bf16.msra.mxu1 (!%p190_p10), %v692_v1 }
  0x16   : > { %s230_s7 = scalar_select %p229_p11, %s767_s18, 1 }
  0x17   : > { %s778_s18 = smov [#allocation2]  }
  0x18   : > { %s611_s8 = sshll.u32 %s230_s7, 5  ;;  %s612_s21 = sshll.u32 %s230_s7, 6 }
  0x19   : > { %s236_s11 = scalar_lea.vmem %s974_s0, %s611_s8  ;;  %s883_s30 = scalar_lea.vmem %s977_s3, %s612_s21 }
  0x1a   : > { %v693_v2 = vld [vmem:[%s236_s11] sm:$0xff]   ;;  %v694_v3 = vld [vmem:[%s236_s11 + $0x8] sm:$0xff]   ;;  %v695_v4 = vld [vmem:[%s236_s11 + $0x10] sm:$0xff]   ;;  %s701_s13 = sshll.u32 %s778_s18, 4  ;;  %s702_s13 = int_to_ptr.vmem [resolvable:$false] %s701_s13 }
  0x1b   : > { %623 = vmatprep.mubr.msk.bf16.mxu0 %vm300_vm0, %v693_v2  ;;  %v696_v5 = vld [vmem:[%s236_s11 + $0x18] sm:$0xff]   ;;  %627 = vmatprep.mubr.msk.bf16.mxu1 %vm300_vm0, %v695_v4  ;;  %s697_s11 = scalar_lea.vmem %s925_s6, 32  ;;  %s703_s21 = scalar_lea.vmem %s702_s13, 64 }
  0x1c   : > { %624 = vmatmul.mubr.msk.bf16.vlgmr.msra.gmra.mrb[0].mxu0 %vm300_vm0, %v694_v3  ;;  %628 = vmatmul.mubr.msk.bf16.vlgmr.msra.gmra.mrb[0].mxu1 %vm300_vm0, %v696_v5  ;;  %p698_p12 = scmp.ne.s32.totalorder %s925_s6, %s697_s11  ;;  %p704_p1 = scmp.lt.s32.totalorder %s925_s6, %s702_s13 }
  0x1d   : > { %p705_p2 = scmp.lt.s32.totalorder %s703_s21, %s697_s11 }
  0x1e   : > { %p699_p13 = pnand %p698_p12, %p844_p4 }
  0x1f   : > { %p706_p3 = por %p705_p2, %p704_p1 }
  0x20   : > { %p700_p0 = pneg %p699_p13 }
  0x22   : > { %p707_p5 = pnand %p706_p3, %p700_p0 }
  0xef   : > { %v625_v8 = vpop.f32.mrb[0].mxu0  ;;  %v629_v11 = vpop.f32.mrb[0].mxu1 }
  0xf0   : > { %v356_v9 = vadd.f32 %v625_v8, %v596_v7  ;;  %v347_v10 = vpop.f32.mrb[1].mxu0  ;;  %v372_v14 = vadd.f32 %v629_v11, %v596_v7  ;;  %v363_v15 = vpop.f32.mrb[1].mxu1 }
  0xf1   : > { %v348_v12 = vadd.f32 %v596_v7, %v347_v10  ;;  %v626_v13 = vpop.f32.mrb[2].mxu0  ;;  %v364_v18 = vadd.f32 %v596_v7, %v363_v15  ;;  %v630_v19 = vpop.f32.mrb[2].mxu1  ;;  %v443_v10 = vld [vmem:[%s873_s14] sm:$0x3] }
  0xf2   : > { %381 = vst.msk [vmem:[%s883_s30 + $0x10] sm:$0xff] %vm378_vm2, %v356_v9  ;;  %v359_v16 = vadd.f32 %v626_v13, %v596_v7  ;;  %v350_v17 = vpop.f32.mrb[3].mxu0  ;;  %385 = vst.msk [vmem:[%s883_s30 + $0x30] sm:$0xff] %vm378_vm2, %v372_v14  ;;  %v366_v22 = vpop.f32.mrb[3].mxu1  ;;  %v416_v23 = vmul.f32 %v356_v9, %v356_v9  ;;  %v396_v27 = vsel %vm378_vm2, %v356_v9, 0.0  ;;  %v375_v33 = vadd.f32 %v630_v19, %v596_v7 }
  0xf3   : > { %379 = vst.msk [vmem:[%s883_s30] sm:$0xff] %vm378_vm2, %v348_v12  ;;  %v414_v20 = vmul.f32 %v348_v12, %v348_v12  ;;  %v351_v21 = vadd.f32 %v596_v7, %v350_v17  ;;  %383 = vst.msk [vmem:[%s883_s30 + $0x20] sm:$0xff] %vm378_vm2, %v364_v18  ;;  %v393_v24 = vsel %vm378_vm2, %v348_v12, 0.0  ;;  %v418_v32 = vmul.f32 %v364_v18, %v364_v18 }
  0xf4   : > { %382 = vst.msk [vmem:[%s883_s30 + $0x18] sm:$0xff] %vm378_vm2, %v359_v16  ;;  %v417_v29 = vmul.f32 %v359_v16, %v359_v16  ;;  %v367_v34 = vadd.f32 %v596_v7, %v366_v22  ;;  %v425_v37 = vsel %vm378_vm2, %v416_v23, 0.0  ;;  %v398_v38 = vsel %vm378_vm2, %v359_v16, 0.0  ;;  %386 = vst.msk [vmem:[%s883_s30 + $0x38] sm:$0xff] %vm378_vm2, %v375_v33 }
  0xf5   : > { %380 = vst.msk [vmem:[%s883_s30 + $0x8] sm:$0xff] %vm378_vm2, %v351_v21  ;;  %v394_v25 = vsel %vm378_vm2, %v351_v21, 0.0  ;;  %v415_v26 = vmul.f32 %v351_v21, %v351_v21  ;;  %v422_v28 = vsel %vm378_vm2, %v414_v20, 0.0  ;;  %v400_v39 = vsel %vm378_vm2, %v364_v18, 0.0 }
  0xf6   : > { %v395_v30 = vadd.f32 %v394_v25, %v393_v24  ;;  %384 = vst.msk [vmem:[%s883_s30 + $0x28] sm:$0xff] %vm378_vm2, %v367_v34  ;;  %v427_v42 = vsel %vm378_vm2, %v417_v29, 0.0  ;;  %v429_v43 = vsel %vm378_vm2, %v418_v32, 0.0  ;;  %v419_v44 = vmul.f32 %v367_v34, %v367_v34 }
  0xf7   : > { %v423_v31 = vsel %vm378_vm2, %v415_v26, 0.0  ;;  %v420_v47 = vmul.f32 %v372_v14, %v372_v14  ;;  %v402_v48 = vsel %vm378_vm2, %v367_v34, 0.0  ;;  %v404_v51 = vsel %vm378_vm2, %v372_v14, 0.0 }
  0xf8   : > { %v397_v35 = vadd.f32 %v396_v27, %v395_v30  ;;  %v424_v36 = vadd.f32 %v423_v31, %v422_v28  ;;  %v421_v52 = vmul.f32 %v375_v33, %v375_v33  ;;  %v431_v53 = vsel %vm378_vm2, %v419_v44, 0.0 }
  0xf9   : > { %v433_v56 = vsel %vm378_vm2, %v420_v47, 0.0  ;;  %v406_v57 = vsel %vm378_vm2, %v375_v33, 0.0 }
  0xfa   : > { %v426_v40 = vadd.f32 %v425_v37, %v424_v36  ;;  %v399_v41 = vadd.f32 %v398_v38, %v397_v35  ;;  %v435_v60 = vsel %vm378_vm2, %v421_v52, 0.0 }
  0xfc   : > { %v401_v45 = vadd.f32 %v400_v39, %v399_v41  ;;  %v428_v46 = vadd.f32 %v427_v42, %v426_v40 }
  0xfe   : > { %v430_v49 = vadd.f32 %v429_v43, %v428_v46  ;;  %v403_v50 = vadd.f32 %v402_v48, %v401_v45 }
 0x100   : > { %v405_v54 = vadd.f32 %v404_v51, %v403_v50  ;;  %v432_v55 = vadd.f32 %v431_v53, %v430_v49 }
 0x102   : > { %v407_v58 = vadd.f32 %v406_v57, %v405_v54  ;;  %v434_v59 = vadd.f32 %v433_v56, %v432_v55 }
 0x104   : > { %v408_v61 = vrot.slane %v407_v58, 4  ;;  %v436_v62 = vadd.f32 %v435_v60, %v434_v59 }
 0x106   : > { %v409_v63 = vadd.f32 %v408_v61, %v407_v58  ;;  %v437_v0 = vrot.slane %v436_v62, 4 }
 0x108   : > { %v410_v1 = vrot.slane %v409_v63, 2  ;;  %v438_v2 = vadd.f32 %v437_v0, %v436_v62 }
 0x10a   : > { %v411_v3 = vadd.f32 %v410_v1, %v409_v63  ;;  %v439_v4 = vrot.slane %v438_v2, 2 }
 0x10c   : > { %v412_v5 = vrot.slane %v411_v3, 1  ;;  %v440_v6 = vadd.f32 %v439_v4, %v438_v2 }
 0x10e   : > { %v441_v7 = vrot.slane %v440_v6, 1  ;;  %v413_v8 = vadd.f32 %v412_v5, %v411_v3 }
 0x110   : > { %v442_v9 = vadd.f32 %v441_v7, %v440_v6 }
 0x112   : > { %v445_v11 = vsel %vm444_vm3, %v413_v8, %v442_v9 }
 0x113   : > { %v446_v12 = vadd.f32 %v445_v11, %v443_v10 }
 0x115   : > { %448 = vst.msk [vmem:[%s873_s14] sm:$0x3] %vm391_vm1, %v446_v12 }
 0x116   : > { %710 = shalt.err (!%p707_p5)
}
 0x117   : > { %s711_s12 = scalar_lea.hbm %s923_s9, 32  ;;  %s715_s24 = scalar_lea.hbm %s978_s4, 64 }
 0x118   : > { %p712_p6 = scmp.ne.s32.totalorder %s923_s9, %s711_s12  ;;  %p716_p10 = scmp.lt.u32.totalorder %s923_s9, %s978_s4 }
 0x119   : > { %p717_p11 = scmp.lt.u32.totalorder %s715_s24, %s711_s12  ;;  %p719_p13 = scmp.lt.u32.totalorder %s711_s12, %s923_s9 }
 0x11a   : > { %p713_p7 = pnand %p712_p6, %p844_p4 }
 0x11b   : > { %p718_p12 = por %p717_p11, %p716_p10 }
 0x11c   : > { %p714_p9 = pneg %p713_p7 }
 0x11d   : > { %p720_p0 = por %p719_p13, %p718_p12 }
 0x11f   : > { %p721_p1 = pnand %p720_p0, %p714_p9 }
 0x121   : > { %724 = shalt.err (!%p721_p1)
}
 0x122   : > { %635 = dma.vmem_to_hbm [thread:$0]  (%p844_p4), %s925_s6, 32, %s923_s9, %s459_s10  }
 0x123 PF: > { %p641_p2 = scmp.ge.s32.totalorder %s775_s20, 2  ;;  %s500_s30 = sand.u32 1, %s755_s15  }
 0x124   : > { %s501_s5 = scalar_lea.sflag [#allocation3], %s500_s30 }
 0x125   : > { %p638_p3 = pnand %p641_p2, %p851_p8 }
 0x127   : > { %750 = dma.done.wait (!%p638_p3), %s501_s5, 32  }
 0x128   : > { %752 = vsyncadd (!%p638_p3), %s501_s5, 4294967264  ;;  %s18_s20 = sadd.s32 1, %s775_s20   ;;  %s981_s15 = smov %s759_s16 }
 0x129   : > { %p15_p5 = scmp.ge.s32.totalorder %s18_s20, 4   ;;  %s982_s16 = smov %s763_s17 }
 0x12a   : > { %s983_s17 = smov %s857_s28  ;;  %s984_s18 = smov %s771_s19 }
 0x12b   : > { %s985_s19 = smov %s987_s23  ;;  %17 = sbr.rel (!%p15_p5) target bundleno = 4 (0x4), region = 83 }
 0x132   :  { %506 = vsyncpa [#allocation3], 1 }
 0x133   :  { %508 = vsyncpa [#allocation3 + $0x1], 1 }

</bundles_post_ra>
